<compile_context>
chip_gen: v6e
topology: v6e:2x2x1
jax: 0.10.0
libtpu: 0.0.40
codegen_flags: <defaults>
</compile_context>

<pallas_src>
import numpy as np
import jax
import jax.numpy as jnp
from jax.experimental import pallas as pl
from jax.experimental.pallas import tpu as pltpu


def _round_up(x, m):
    return ((x + m - 1) // m) * m


# ----------------------------------------------------------------------------
# Pallas kernels
# ----------------------------------------------------------------------------
def _signature_kernel(adj_ref, fidx_ref, o_ref):
    """counts[v, c] = #neighbours of vertex v inside final cell c.

    The (k, Cpad) one-hot of the final partition is built on-device from the
    (k, 1) int32 cell-index vector (H2D is n*4 bytes instead of n*Cpad*4)."""
    k = fidx_ref.shape[0]
    cpad = o_ref.shape[1]
    col = jax.lax.broadcasted_iota(jnp.int32, (k, cpad), 1)
    onehot = (fidx_ref[...] == col).astype(adj_ref.dtype)
    o_ref[...] = jnp.dot(adj_ref[...], onehot, preferred_element_type=jnp.float32)


@jax.jit
def signature_counts(adj_sig, final_idx_col):
    """(n, n) adjacency @ on-device one-hot(final cells) -> (n, Cpad) f32.

    adj (the only n^2 operand) is row-tiled so VMEM stays bounded if n grows
    (v7x: 64 MiB physical / 32 MiB default scoped); Cpad is a fixed multiple of
    128 so the store is lane-dense and there is exactly one compile per shape."""
    n, k = adj_sig.shape
    cpad = _round_up(max(k, 128), 128)
    tm = n if n <= 256 else 256
    return pl.pallas_call(
        _signature_kernel,
        out_shape=jax.ShapeDtypeStruct((n, cpad), jnp.float32),
        grid=(pl.cdiv(n, tm),),
        in_specs=[pl.BlockSpec((tm, k), lambda i: (i, 0)),
                  pl.BlockSpec((k, 1), lambda i: (0, 0))],
        out_specs=pl.BlockSpec((tm, cpad), lambda i: (i, 0)),
        compiler_params=pltpu.CompilerParams(
            dimension_semantics=("parallel",)),
    )(adj_sig, final_idx_col)


def _cell_embed_kernel(lookup_ref, sig_ref, mask_ref,
                       emb_ref, w1_ref, b1_ref, w2z_ref, b2z_ref,
                       wo_ref, bo_ref, out_ref):
    """All split-cell trace embeddings of one sweep, reduced to the sweep trace.

    Four MXU passes total:
      left_z = [par_oh | cnt_hist] @ [emb_parent ; emb_cnt]   -> lanes [0:hid]
      h      = relu(sig @ W1 + b1)
      sig_z  = h @ W2z + b2z                                   -> lanes [hid:2*hid]
      out    = (left_z + sig_z) @ Wout_pad + bout_pad          (== cat([...]) @ Wout)
    Padded event rows are zeroed by `mask` before the in-kernel row sum, so the
    output is a fixed (1, OUT_PAD) regardless of the number of split events."""
    left_z = jnp.dot(lookup_ref[...], emb_ref[...],
                     preferred_element_type=jnp.float32)
    h = jnp.dot(sig_ref[...], w1_ref[...],
                preferred_element_type=jnp.float32) + b1_ref[...]
    h = jnp.maximum(h, 0.0)
    sig_z = jnp.dot(h, w2z_ref[...],
                    preferred_element_type=jnp.float32) + b2z_ref[...]
    z = left_z + sig_z
    out = jnp.dot(z, wo_ref[...],
                  preferred_element_type=jnp.float32) + bo_ref[...]
    out_ref[...] = jnp.sum(out * mask_ref[...], axis=0, keepdims=True)


@jax.jit
def cell_embed_trace(lookup_oh, sig_mat, row_mask,
                     emb_cat, W1p, b1, W2z, b2z, Wout_pad, bout_pad):
    # Single grid step, full-array VMEM blocks: at Bp = O(n) the per-step grid
    # overhead and re-staging of 8 constant weight operands would dominate a
    # handful of tiny MXU passes.
    out_pad = Wout_pad.shape[1]
    return pl.pallas_call(
        _cell_embed_kernel,
        out_shape=jax.ShapeDtypeStruct((1, out_pad), jnp.float32),
    )(lookup_oh, sig_mat, row_mask, emb_cat, W1p, b1, W2z, b2z,
      Wout_pad, bout_pad)


# ----------------------------------------------------------------------------
# Host-side partition-refinement glue (semantics of the missing `test.*` module)
# ----------------------------------------------------------------------------
# TODO(synk): `test.find_cells/replace_cell/append_largest_except_one/find_color`
# are not defined in the reference source; standard Traces/WL semantics are used
# here, and `for X in cells` iterates a snapshot of the (mutating) cell list.
def find_cells(colors):
    colors = np.asarray(colors)
    order = np.argsort(colors, kind="stable")
    cells, cur = [], []
    for v in order:
        v = int(v)
        if cur and colors[v] != colors[cur[-1]]:
            cells.append(cur)
            cur = []
        cur.append(v)
    if cur:
        cells.append(cur)
    return cells


def replace_cell(cells, X, groups):
    i = cells.index(X)
    cells[i:i + 1] = [list(g) for g in groups]


def append_largest_except_one(alpha, groups):
    if len(groups) <= 1:
        return
    largest = max(range(len(groups)), key=lambda i: len(groups[i]))
    for i, g in enumerate(groups):
        if i != largest:
            alpha.append(list(g))


def find_color(cells):
    n = sum(len(c) for c in cells)
    color = [0] * n
    start = 0
    for c in cells:
        for v in c:
            color[v] = start
        start += len(c)
    return color


# ----------------------------------------------------------------------------
# WLStep model (parameters owned by its TraceCollector)
# ----------------------------------------------------------------------------
class WLStepPallas:
    def __init__(self, n=16, hid=32, out_dim=64, key=None):
        self.n = n
        self.hid = hid
        self.out_dim = out_dim
        self.VPAD = _round_up(max(n + 1, 128), 128)       # parent / count vocab lanes
        self.SIG_PAD = _round_up(max(n, 128), 128)        # sig-MLP input lanes
        self.OUT_PAD = _round_up(max(out_dim, 128), 128)  # lane-dense output
        self.BP = _round_up(max(n, 8), 8)                 # fixed event-batch pad
        # bf16 is exact for 0/1 adjacency and integer degree counts < 256
        self._sig_dtype = jnp.bfloat16 if n <= 256 else jnp.float32

        if key is None:
            key = jax.random.PRNGKey(0)
        ks = jax.random.split(key, 8)
        s = 0.05
        emb_parent = np.asarray(jax.random.normal(ks[0], (n + 1, hid)) * s, np.float32)
        emb_cnt = np.asarray(jax.random.normal(ks[1], (n + 1, hid)) * s, np.float32)
        W1 = np.asarray(jax.random.normal(ks[2], (n, hid)) / np.sqrt(n), np.float32)
        b1 = np.asarray(jax.random.normal(ks[3], (1, hid)) * s, np.float32)
        W2 = np.asarray(jax.random.normal(ks[4], (hid, hid)) / np.sqrt(hid), np.float32)
        b2 = np.asarray(jax.random.normal(ks[5], (1, hid)) * s, np.float32)
        Wout = np.asarray(jax.random.normal(ks[6], (2 * hid, out_dim)) / np.sqrt(2 * hid),
                          np.float32)
        bout = np.asarray(jax.random.normal(ks[7], (1, out_dim)) * s, np.float32)

        # ---- fused / padded parameter layouts (built once at init) ----------
        emb_cat = np.zeros((2 * self.VPAD, 2 * hid), np.float32)
        emb_cat[:n + 1, :hid] = emb_parent                        # parent one-hot lanes
        emb_cat[self.VPAD:self.VPAD + n + 1, :hid] = emb_cnt      # count-histogram lanes
        W1p = np.zeros((self.SIG_PAD, hid), np.float32)
        W1p[:n] = W1
        W2z = np.zeros((hid, 2 * hid), np.float32)                # sig_emb -> lanes [hid:2h]
        W2z[:, hid:] = W2
        b2z = np.zeros((1, 2 * hid), np.float32)
        b2z[:, hid:] = b2
        Wout_pad = np.zeros((2 * hid, self.OUT_PAD), np.float32)
        Wout_pad[:, :out_dim] = Wout
        bout_pad = np.zeros((1, self.OUT_PAD), np.float32)
        bout_pad[:, :out_dim] = bout

        self.emb_cat = jnp.asarray(emb_cat)
        self.W1p = jnp.asarray(W1p)
        self.b1 = jnp.asarray(b1)
        self.W2z = jnp.asarray(W2z)
        self.b2z = jnp.asarray(b2z)
        self.Wout_pad = jnp.asarray(Wout_pad)
        self.bout_pad = jnp.asarray(bout_pad)
        self._zero_trace = jnp.zeros((out_dim,), jnp.float32)

    # --- batched TraceCollector.cell_embed for one refinement sweep ----------
    def _batched_cell_embed(self, adj_sig, final_cells, events, n):
        """events: list of (X_sorted, cells_snapshot, parent_colour, cnts_W)."""
        # One signature matmul per sweep: degree of every vertex to every FINAL
        # cell.  Every split-event's snapshot partition is a coarsening of the
        # final partition, so per-event degree vectors are host column sums.
        final_idx = np.full((n, 1), -1, dtype=np.int32)
        for idx, cell in enumerate(final_cells):
            final_idx[np.asarray(cell, dtype=np.int64), 0] = idx
        counts_fin = signature_counts(adj_sig, jnp.asarray(final_idx))
        counts_fin = np.rint(np.asarray(counts_fin)).astype(np.int64)  # the one D2H sync

        lookup = np.zeros((self.BP, 2 * self.VPAD), np.float32)  # [par one-hot | cnt hist]
        sig_mat = np.zeros((self.BP, self.SIG_PAD), np.float32)
        mask = np.zeros((self.BP, 1), np.float32)
        for e, (X_sorted, snap_cells, parent_col, cnts_W) in enumerate(events):
            mask[e, 0] = 1.0
            lookup[e, int(parent_col)] = 1.0
            for c in cnts_W:
                lookup[e, self.VPAD + int(c)] += 1.0
            col_sets = [np.asarray(sorted({int(final_idx[v, 0]) for v in cell}),
                                   dtype=np.int64) for cell in snap_cells]
            deg_vectors = [tuple(int(counts_fin[v, cols].sum()) for cols in col_sets)
                           for v in X_sorted]
            first_vec = min(deg_vectors)   # original keeps only the first sorted row
            sig_mat[e, :len(first_vec)] = np.asarray(first_vec, np.float32)

        out = cell_embed_trace(jnp.asarray(lookup), jnp.asarray(sig_mat),
                               jnp.asarray(mask),
                               self.emb_cat, self.W1p, self.b1, self.W2z, self.b2z,
                               self.Wout_pad, self.bout_pad)
        # sum of per-event embeddings (already reduced in-kernel); stays on device
        return out[0, :self.out_dim]

    # --- refinement -----------------------------------------------------------
    def refinement(self, colors, adj_np, adj_sig, cells=None, alpha=None):
        colors_np = np.asarray(colors)
        n = colors_np.shape[0]
        if not cells:
            cells = find_cells(colors_np)
        if not alpha:
            alpha = [list(c) for c in cells]
        W = alpha.pop()
        W_idx = np.asarray(W, dtype=np.int64).reshape(-1)

        # classify_by_edges for the WHOLE sweep: host numpy (per review — the
        # (1,n)@(n,n) matvec was pure dispatch/sync cost at these sizes).
        counts_np = adj_np[:, W_idx].sum(axis=1)

        events = []   # (X_sorted, cells_snapshot_after_replace, parent_colour, counts)
        for X in list(cells):
            counts = [int(counts_np[v]) for v in X]
            bucket = {}
            for v, c in zip(X, counts):
                bucket.setdefault(c, []).append(v)
            groups = [bucket[k] for k in sorted(bucket.keys())]
            if len(groups) > 1:
                replace_cell(cells, X, groups)
                parent_col = int(colors_np[X[0]])
                events.append((sorted(int(v) for v in X),
                               [list(c) for c in cells],
                               parent_col, counts))
            if X in alpha:
                replace_cell(alpha, X, groups)
            else:
                append_largest_except_one(alpha, groups)

        new_color = find_color(cells)
        if events:
            trace = self._batched_cell_embed(adj_sig, cells, events, n)
        else:
            trace = self._zero_trace
        return new_color, cells, alpha, trace

    def individualize(self, color, w):
        color = np.asarray(color)
        out = color.copy()
        cw = color[w]
        for v in range(len(color)):
            if color[v] < cw or v == w:
                continue
            out[v] = color[v] + 1
        return out

    def iterate_wl(self, color, adj_np, adj_sig, splitter):
        n = len(np.asarray(color))
        new_color = self.individualize(color, splitter)
        alpha = [[int(splitter)]]
        new_cells = None
        trace_stack = []
        while int(np.max(np.asarray(new_color))) != n - 1 and alpha:
            new_color, new_cells, alpha, cur_trace = self.refinement(
                new_color, adj_np, adj_sig, cells=new_cells, alpha=alpha)
            trace_stack.append(cur_trace)
        if trace_stack:
            trace = jnp.mean(jnp.stack(trace_stack), axis=0)
        else:
            trace = self._zero_trace
        return new_color, trace

    # --- forward ---------------------------------------------------------------
    def forward(self, colors_in, adj, splitter=None):
        colors_np = np.asarray(colors_in)
        # host copy for classify_by_edges (no device roundtrip per sweep):
        adj_np = np.rint(np.asarray(adj)).astype(np.int64)
        # device copy (bf16, exact for 0/1 + counts < 256) for the signature matmul:
        adj_sig = jnp.asarray(np.asarray(adj, dtype=np.float32), dtype=self._sig_dtype)
        if not splitter:
            new_color, _, _, trace = self.refinement(colors_np, adj_np, adj_sig)
            return jnp.asarray(new_color, dtype=jnp.int32), trace
        new_color, trace = self.iterate_wl(colors_np, adj_np, adj_sig, splitter)
        return jnp.asarray(new_color, dtype=jnp.int32), trace


# ----------------------------------------------------------------------------
if __name__ == "__main__":
    n = 16
    key = jax.random.PRNGKey(0)
    k_adj, k_par = jax.random.split(key)

    # deterministic random symmetric adjacency (no self loops), dense f32
    a = (jax.random.uniform(k_adj, (n, n)) < 0.3).astype(jnp.float32)
    adj = jnp.triu(a, 1)
    adj = adj + adj.T

    colors_in = jnp.zeros((n,), dtype=jnp.int32)   # single initial colour class
    model = WLStepPallas(n=n, hid=32, out_dim=64, key=k_par)

    # single refinement (no splitter)
    colors_out, trace = model.forward(colors_in, adj)
    jax.block_until_ready(trace)
    assert colors_out.shape == (n,)
    assert trace.shape == (64,)

    # full WL iteration path (splitter vertex 1)
    colors_wl, trace_wl = model.forward(colors_in, adj, splitter=1)
    jax.block_until_ready(trace_wl)
    assert colors_wl.shape == (n,)
    assert trace_wl.shape == (64,)

    print("KERNEL_OK")
</pallas_src>

<mosaic_0001>
module attributes {stable_mosaic.version = 11 : i64} {
  func.func @_signature_kernel(%arg0: i32, %arg1: memref<16x16xbf16, #tpu.memory_space<vmem>>, %arg2: memref<16x1xi32, #tpu.memory_space<vmem>>, %arg3: memref<16x128xf32, #tpu.memory_space<vmem>>) attributes {dimension_semantics = [#tpu.dimension_semantics<parallel>], iteration_bounds = array<i64: 1>, scalar_prefetch = 0 : i64, scratch_operands = 0 : i64, tpu.core_type = #tpu.core_type<tc>, window_params = [{transform_indices = @transform_0, window_bounds = array<i64: 16, 16>}, {pipeline_mode = #tpu.pipeline_mode<synchronous>, transform_indices = @transform_1, window_bounds = array<i64: 16, 1>}, {transform_indices = @transform_2, window_bounds = array<i64: 16, 128>}]} {
    %0 = tpu.iota {dimensions = array<i32: 1>} : vector<16x128xi32>
    %c0 = arith.constant 0 : index
    %c0_0 = arith.constant 0 : index
    %1 = vector.load %arg2[%c0, %c0_0] : memref<16x1xi32, #tpu.memory_space<vmem>>, vector<16x1xi32>
    %2 = vector.broadcast %1 : vector<16x1xi32> to vector<16x128xi32>
    %3 = arith.cmpi eq, %2, %0 : vector<16x128xi32>
    %4 = arith.extui %3 : vector<16x128xi1> to vector<16x128xi32>
    %5 = arith.sitofp %4 : vector<16x128xi32> to vector<16x128xf32>
    %6 = arith.truncf %5 : vector<16x128xf32> to vector<16x128xbf16>
    %c0_1 = arith.constant 0 : index
    %c0_2 = arith.constant 0 : index
    %7 = vector.load %arg1[%c0_1, %c0_2] : memref<16x16xbf16, #tpu.memory_space<vmem>>, vector<16x16xbf16>
    %cst = arith.constant dense<0.000000e+00> : vector<16x128xf32>
    %8 = tpu.matmul %7, %6, %cst {dimension_numbers = #tpu.dot_dimension_numbers<[1], [0], [0], [1], [0, 0, 1, 1], [], []>} : vector<16x16xbf16>, vector<16x128xbf16>, vector<16x128xf32> -> vector<16x128xf32>
    %c0_3 = arith.constant 0 : index
    %c0_4 = arith.constant 0 : index
    %9 = vector.load %arg3[%c0_3, %c0_4] : memref<16x128xf32, #tpu.memory_space<vmem>>, vector<16x128xf32>
    tpu.vector_store %arg3[%c0_3, %c0_4], %8 {strides = array<i32>} : memref<16x128xf32, #tpu.memory_space<vmem>>, vector<16x128xf32>,
    return
  }
  func.func @transform_0(%arg0: i32) -> (i32, i32) {
    %c0_i32 = arith.constant 0 : i32
    %c0_i32_0 = arith.constant 0 : i32
    return %arg0, %c0_i32 : i32, i32
  }
  func.func @transform_1(%arg0: i32) -> (i32, i32) {
    %c0_i32 = arith.constant 0 : i32
    %c0_i32_0 = arith.constant 0 : i32
    %c0_i32_1 = arith.constant 0 : i32
    return %c0_i32, %c0_i32_0 : i32, i32
  }
  func.func @transform_2(%arg0: i32) -> (i32, i32) {
    %c0_i32 = arith.constant 0 : i32
    %c0_i32_0 = arith.constant 0 : i32
    return %arg0, %c0_i32 : i32, i32
  }
}

</mosaic_0001>

<bundles_post_ra>
// kernel: signature_counts.1
= control target key start
LH: loop header
LB: loop body
LE: loop exit
PB: predicated region body
PF: predicated region fallthrough
CT: control target
= control target key end

     0   :  { %v145_v1 = vmov 0   ;;  %s179_s0 = inlined_call_operand.vmem [shape: bf16[16,16], index: 0, kind: input, shape index: {}]   ;;  %s180_s1 = inlined_call_operand.vmem [shape: s32[16,1], index: 1, kind: input, shape index: {}]   ;;  %s181_s2 = inlined_call_operand.hbm [shape: f32[16,128], index: 2, kind: output, shape index: {}]  }
   0x1   :  { %v15_v0 = vld [vmem:[%s180_s1] sm:$0xff]  ;;  %121 = vset.pattern.permute.xlu0 %v145_v1 }
   0x2   :  { %7 = vsyncpa [#allocation3], 0  ;;  %18 = vperm.xlu0 %121, %v15_v0   ;;  %v16_v2 = vld [vmem:[%s180_s1 + $0x8] sm:$0xff]  ;;  %v146_v3 = vmov 0.0   ;;  %vm147_vm0 = vmmov 0   ;;  %v13_v4 = vlaneseq  ;;  %v122_v8 = vld [vmem:[%s179_s0] sm:$0xff]  }
   0x3   :  { %108 = vmatprep.subr.bf16.mxu0 %v146_v3  ;;  %110 = vmatprep.mubr.msk.bf16.mxu0 %vm147_vm0, %v146_v3  ;;  %v148_v9 = vmov 1.0|1.0   ;;  %vm37_vm4 = vcmask 130048   ;;  %s149_s1 = smov [#allocation2]  }
   0x4   :  { %v14_v6 = vand.u32 127, %v13_v4  ;;  %s89_s15 = sshll.u32 %s149_s1, 4  ;;  %s90_s15 = int_to_ptr.vmem [resolvable:$true] %s89_s15 }
   0x5   :  { %s123_s16 = scalar_lea.vmem %s90_s15, 256  ;;  %p128_p1 = scmp.lt.s32.totalorder %s90_s15, %s90_s15 }
   0x6   :  { %21 = vperm.xlu0 %121, %v16_v2   ;;  %p124_p0 = scmp.ne.s32.totalorder %s90_s15, %s123_s16  ;;  %p129_p2 = scmp.lt.s32.totalorder %s123_s16, %s123_s16 }
   0x8   :  { %p130_p3 = por %p129_p2, %p128_p1 }
   0xa   :  { %p131_p4 = pnand %p130_p3, %p124_p0 }
  0x7d   :  { %v19_v5 = vpop.permute.xlu0 %18 }
  0x7e   :  { %vm23_vm1 = vcmp.eq.s32.totalorder %v19_v5, %v14_v6 }
  0x81   :  { %v22_v7 = vpop.permute.xlu0 %21 }
  0x82   :  { %vm24_vm2 = vcmp.eq.s32.totalorder %v22_v7, %v14_v6 }
  0x83   :  { %vm103_vm3 = vmpackc.low %vm24_vm2, %vm23_vm1 }
  0x84   :  { %109 = vmatpush3.bf16.msk.msra.mxu0 %vm103_vm3, %v148_v9 }
  0x87   :  { %111 = vmatmul.mubr.msk.bf16.vlgmr.msra.gmra.mxu0 %vm37_vm4, %v122_v8 }
 0x147   :  { %v75_v10 = vpop.f32.mrf.mxu0 }
 0x148   :  { %82 = vst [vmem:[#allocation2] sm:$0xff] %v75_v10 }
 0x149   :  { %v112_v11 = vpop.f32.mrf.mxu0 }
 0x14b   :  { %v78_v12 = vpop.f32.mrf.mxu0 }
 0x14c   :  { %83 = vst [vmem:[#allocation2 + $0x8] sm:$0xff] %v78_v12 }
 0x14d   :  { %v113_v13 = vpop.f32.mrf.mxu0 }
 0x14e   :  { %134 = shalt.err (!%p131_p4)
}
 0x14f   :  { %s150_s0 = smov 128   ;;  %s151_s17 = smov 8  }
 0x150   :  { %95 = dma.vmem_to_hbm [thread:$0]  %s90_s15, 256, %s181_s2, [#allocation3], %s150_s0, %s150_s0, %s151_s17  }
 0x151   :  { %143 = dma.done.wait [#allocation3], 256  }
 0x152   :  { %144 = vsyncadd [#allocation3], 4294967040 }
 0x153   :  { %99 = vsyncpa [#allocation3], 1 }

</bundles_post_ra>
